<compile_context>
chip_gen: v6e
topology: v6e:2x2x1
jax: 0.10.0
libtpu: 0.0.40
codegen_flags: <defaults>
</compile_context>

<pallas_src>
import math
import functools

import jax
import jax.numpy as jnp
from jax.experimental import pallas as pl
from jax.experimental.pallas import tpu as pltpu


def _round_up(n, m):
    return ((n + m - 1) // m) * m


def _pad2(a, rows, cols):
    """Zero-pad a 2-D array up to (rows, cols)."""
    return jnp.pad(a, ((0, rows - a.shape[0]), (0, cols - a.shape[1])))


_NEG_BIG = -1e30  # masks padded output columns inside the fused log-softmax


# ---------------------------------------------------------------------------
# Kernel 1: hoisted input projection  xproj = x @ W_x + b  (one tall matmul).
# ---------------------------------------------------------------------------
def _xproj_kernel(x_ref, wx_ref, b_ref, out_ref):
    x = x_ref[...].astype(wx_ref.dtype)  # bf16 into the MXU
    out_ref[...] = (
        jnp.dot(x, wx_ref[...], preferred_element_type=jnp.float32) + b_ref[...]
    )


# ---------------------------------------------------------------------------
# Kernel 2: the recurrence. grid = (batch_tiles, T); h/c carried in VMEM
# scratch; W_h / W_lin / b_lin VMEM-resident (constant index maps).
# ---------------------------------------------------------------------------
def _lstm_seq_kernel(xproj_ref, h0_ref, c0_ref, wh_ref, wl_ref, bl_ref,
                     lp_ref, h_out_ref, c_out_ref, h_sc, c_sc):
    t = pl.program_id(1)
    Hp = h_sc.shape[1]  # padded hidden size (multiple of 128)

    @pl.when(t == 0)
    def _():
        h_sc[...] = h0_ref[...]
        c_sc[...] = c0_ref[...]

    h = h_sc[...]
    c = c_sc[...]

    # Recurrent projection (the x-projection was hoisted out of the loop).
    gates = xproj_ref[...] + jnp.dot(
        h.astype(wh_ref.dtype), wh_ref[...], preferred_element_type=jnp.float32)

    # One sigmoid over 3*Hp lanes (i, f, o), one tanh over the last Hp (g).
    sig = jax.nn.sigmoid(gates[:, : 3 * Hp])
    i_t = sig[:, 0 * Hp:1 * Hp]
    f_t = sig[:, 1 * Hp:2 * Hp]
    o_t = sig[:, 2 * Hp:3 * Hp]
    g_t = jnp.tanh(gates[:, 3 * Hp:])

    c_new = f_t * c + i_t * g_t
    h_new = o_t * jnp.tanh(c_new)
    h_sc[...] = h_new
    c_sc[...] = c_new

    # Linear + LogSoftmax(dim=1).  Padded output columns carry a -1e30 bias
    # (baked into bl) so they vanish from the max and the exp-sum.
    logits = jnp.dot(h_new.astype(wl_ref.dtype), wl_ref[...],
                     preferred_element_type=jnp.float32) + bl_ref[...]
    m = jnp.max(logits, axis=1, keepdims=True)
    z = logits - m
    lse = jnp.log(jnp.sum(jnp.exp(z), axis=1, keepdims=True))
    lp_ref[0] = z - lse

    @pl.when(t == pl.num_programs(1) - 1)
    def _():
        h_out_ref[...] = h_new
        c_out_ref[...] = c_new


# ---------------------------------------------------------------------------
# One-time parameter packing: fuse gate weights, pad to lane tiles, cast bf16.
# ---------------------------------------------------------------------------
def pack_params(params):
    """Fuse the 4 gate weight matrices into (I, 4*Hp) / (Hp, 4*Hp) bf16 blocks
    (gate order [i | f | o | c]); biases stay f32; padded b_lin columns are
    set to -1e30 so the in-kernel log-softmax needs no mask."""
    I, H = params["W_xi"].shape
    O = params["W_lin"].shape[1]
    H_pad = _round_up(H, 128)
    O_pad = _round_up(O, 128)
    f32, bf16 = jnp.float32, jnp.bfloat16

    def px(w):   # (I, H)  -> (I, Hp)  bf16
        return _pad2(w.astype(f32), I, H_pad).astype(bf16)

    def ph(w):   # (H, H)  -> (Hp, Hp) bf16
        return _pad2(w.astype(f32), H_pad, H_pad).astype(bf16)

    def pb(b):   # (H,)    -> (1, Hp)  f32
        return _pad2(b.astype(f32).reshape(1, -1), 1, H_pad)

    W_x = jnp.concatenate([px(params["W_xi"]), px(params["W_xf"]),
                           px(params["W_xo"]), px(params["W_xc"])], axis=1)
    W_h = jnp.concatenate([ph(params["W_hi"]), ph(params["W_hf"]),
                           ph(params["W_ho"]), ph(params["W_hc"])], axis=1)
    b = jnp.concatenate([pb(params["b_i"]), pb(params["b_f"]),
                         pb(params["b_o"]), pb(params["b_c"])], axis=1)
    W_l = _pad2(params["W_lin"].astype(f32), H_pad, O_pad).astype(bf16)
    b_l = jnp.full((1, O_pad), _NEG_BIG, f32)
    b_l = b_l.at[0, :O].set(params["b_lin"].astype(f32))
    return {"W_x": W_x, "W_h": W_h, "b": b, "W_lin": W_l, "b_lin": b_l}


# ---------------------------------------------------------------------------
# Sequence wrapper: pad once, hoist x-projection, run the fused recurrence.
# ---------------------------------------------------------------------------
@functools.partial(jax.jit, static_argnames=("num_outputs",))
def lstm_model_forward_seq(xs, h0, c0, packed, *, num_outputs):
    """Run T LSTMModel steps in one fused kernel.

    xs: (T, B, I); h0, c0: (B, H).  Returns (log_probs (T,B,O), h_T, c_T)."""
    T, B, I = xs.shape
    H = h0.shape[1]
    H_pad = packed["W_h"].shape[0]
    G = packed["W_h"].shape[1]            # 4 * H_pad
    O_pad = packed["W_lin"].shape[1]
    f32 = jnp.float32

    B_pad = _round_up(max(B, 8), 8)
    BT = min(B_pad, 256)                  # batch tile ("parallel" grid axis)
    B_pad = _round_up(B_pad, BT)
    n_b = B_pad // BT

    xs_p = jnp.pad(xs.astype(f32), ((0, 0), (0, B_pad - B), (0, 0)))
    h_p = _pad2(h0.astype(f32), B_pad, H_pad)
    c_p = _pad2(c0.astype(f32), B_pad, H_pad)

    weight_bytes = sum(int(v.size) * v.dtype.itemsize for v in packed.values())
    vmem_limit = int(min(64 * 2**20, max(32 * 2**20, 2 * weight_bytes + 8 * 2**20)))

    # ---- hoisted input projection: one tall (T*B_pad, 4Hp) matmul ----------
    TB = T * B_pad
    t_chunk = max(1, min(T, 512 // BT))
    row_tile = BT * t_chunk               # multiple of 8 and of BT
    TB_pad = _round_up(TB, row_tile)
    xs_flat = xs_p.reshape(TB, I)
    if TB_pad != TB:
        xs_flat = jnp.pad(xs_flat, ((0, TB_pad - TB), (0, 0)))

    xproj = pl.pallas_call(
        _xproj_kernel,
        out_shape=jax.ShapeDtypeStruct((TB_pad, G), f32),
        grid=(TB_pad // row_tile,),
        in_specs=[
            pl.BlockSpec((row_tile, I), lambda r: (r, 0)),
            pl.BlockSpec((I, G), lambda r: (0, 0)),        # W_x resident
            pl.BlockSpec((1, G), lambda r: (0, 0)),        # b resident
        ],
        out_specs=pl.BlockSpec((row_tile, G), lambda r: (r, 0)),
        compiler_params=pltpu.CompilerParams(
            dimension_semantics=("parallel",), vmem_limit_bytes=vmem_limit),
    )(xs_flat, packed["W_x"], packed["b"])

    # ---- fused recurrence + Linear + LogSoftmax over all T steps -----------
    lp_p, h_out_p, c_out_p = pl.pallas_call(
        _lstm_seq_kernel,
        out_shape=(
            jax.ShapeDtypeStruct((T, B_pad, O_pad), f32),
            jax.ShapeDtypeStruct((B_pad, H_pad), f32),
            jax.ShapeDtypeStruct((B_pad, H_pad), f32),
        ),
        grid=(n_b, T),
        in_specs=[
            # row-block (t, b) of the flat (TB_pad, 4Hp) projection
            pl.BlockSpec((BT, G), lambda b, t: (t * n_b + b, 0)),
            pl.BlockSpec((BT, H_pad), lambda b, t: (b, 0)),      # h0
            pl.BlockSpec((BT, H_pad), lambda b, t: (b, 0)),      # c0
            pl.BlockSpec((H_pad, G), lambda b, t: (0, 0)),       # W_h resident
            pl.BlockSpec((H_pad, O_pad), lambda b, t: (0, 0)),   # W_lin resident
            pl.BlockSpec((1, O_pad), lambda b, t: (0, 0)),       # b_lin resident
        ],
        out_specs=(
            pl.BlockSpec((1, BT, O_pad), lambda b, t: (t, b, 0)),
            pl.BlockSpec((BT, H_pad), lambda b, t: (b, 0)),
            pl.BlockSpec((BT, H_pad), lambda b, t: (b, 0)),
        ),
        scratch_shapes=[pltpu.VMEM((BT, H_pad), f32),
                        pltpu.VMEM((BT, H_pad), f32)],
        input_output_aliases={1: 1, 2: 2},   # h0 -> h_out, c0 -> c_out
        compiler_params=pltpu.CompilerParams(
            dimension_semantics=("parallel", "arbitrary"),
            vmem_limit_bytes=vmem_limit),
    )(xproj, h_p, c_p, packed["W_h"], packed["W_lin"], packed["b_lin"])

    return lp_p[:, :B, :num_outputs], h_out_p[:B, :H], c_out_p[:B, :H]


def lstm_model_forward(x, h_t, c_t, packed, *, num_outputs):
    """Single timestep — exact LSTMModel.forward semantics: (log_probs, h, c)."""
    lp, h_new, c_new = lstm_model_forward_seq(
        x[None], h_t, c_t, packed, num_outputs=num_outputs)
    return lp[0], h_new, c_new


# ---------------------------------------------------------------------------
# Parameter init (mirrors the PyTorch module) and plain-JAX references.
# ---------------------------------------------------------------------------
def init_params(key, num_inputs, num_hiddens, num_outputs):
    stdv = 1.0 / math.sqrt(num_hiddens)
    keys = jax.random.split(key, 14)

    def u(k, shape, bound):
        return jax.random.uniform(k, shape, jnp.float32, -bound, bound)

    return {
        "W_xi": u(keys[0], (num_inputs, num_hiddens), stdv),
        "W_hi": u(keys[1], (num_hiddens, num_hiddens), stdv),
        "b_i": u(keys[2], (num_hiddens,), stdv),
        "W_xf": u(keys[3], (num_inputs, num_hiddens), stdv),
        "W_hf": u(keys[4], (num_hiddens, num_hiddens), stdv),
        "b_f": u(keys[5], (num_hiddens,), stdv),
        "W_xc": u(keys[6], (num_inputs, num_hiddens), stdv),
        "W_hc": u(keys[7], (num_hiddens, num_hiddens), stdv),
        "b_c": u(keys[8], (num_hiddens,), stdv),
        "W_xo": u(keys[9], (num_inputs, num_hiddens), stdv),
        "W_ho": u(keys[10], (num_hiddens, num_hiddens), stdv),
        "b_o": u(keys[11], (num_hiddens,), stdv),
        # nn.Linear(num_hiddens, num_outputs), stored transposed as (H, O).
        "W_lin": u(keys[12], (num_hiddens, num_outputs), 1.0 / math.sqrt(num_hiddens)),
        "b_lin": u(keys[13], (num_outputs,), 1.0 / math.sqrt(num_hiddens)),
    }


def reference_forward(x, h_t, c_t, p):
    i_t = jax.nn.sigmoid(x @ p["W_xi"] + h_t @ p["W_hi"] + p["b_i"])
    f_t = jax.nn.sigmoid(x @ p["W_xf"] + h_t @ p["W_hf"] + p["b_f"])
    g_t = jnp.tanh(x @ p["W_xc"] + h_t @ p["W_hc"] + p["b_c"])
    o_t = jax.nn.sigmoid(x @ p["W_xo"] + h_t @ p["W_ho"] + p["b_o"])
    c_new = f_t * c_t + i_t * g_t
    h_new = o_t * jnp.tanh(c_new)
    logits = h_new @ p["W_lin"] + p["b_lin"]
    return jax.nn.log_softmax(logits, axis=1), h_new, c_new


def reference_forward_seq(xs, h0, c0, p):
    def step(carry, x):
        h, c = carry
        lp, h, c = reference_forward(x, h, c, p)
        return (h, c), lp

    (hT, cT), lps = jax.lax.scan(step, (h0, c0), xs)
    return lps, hT, cT


if __name__ == "__main__":
    batch = 2
    num_inputs = 16
    num_hiddens = 32
    num_outputs = 8
    seq_len = 8

    key = jax.random.PRNGKey(0)
    k_params, k_x, k_xs = jax.random.split(key, 3)

    params = init_params(k_params, num_inputs, num_hiddens, num_outputs)
    packed = pack_params(params)

    h0 = jnp.zeros((batch, num_hiddens), jnp.float32)  # init_hidden() semantics
    c0 = jnp.zeros((batch, num_hiddens), jnp.float32)

    # --- single step: exact LSTMModel.forward semantics ---
    x = jax.random.normal(k_x, (batch, num_inputs), jnp.float32)
    lp, h1, c1 = lstm_model_forward(x, h0, c0, packed, num_outputs=num_outputs)
    jax.block_until_ready((lp, h1, c1))

    ref_lp, ref_h, ref_c = reference_forward(x, h0, c0, params)
    # bf16 weights on the MXU -> loosened tolerances vs the f32 reference.
    assert jnp.allclose(lp, ref_lp, atol=5e-2, rtol=5e-2)
    assert jnp.allclose(h1, ref_h, atol=5e-2, rtol=5e-2)
    assert jnp.allclose(c1, ref_c, atol=5e-2, rtol=5e-2)

    # --- fused multi-step sequence: time loop inside the kernel ---
    xs = jax.random.normal(k_xs, (seq_len, batch, num_inputs), jnp.float32)
    lps, hT, cT = lstm_model_forward_seq(xs, h0, c0, packed, num_outputs=num_outputs)
    jax.block_until_ready((lps, hT, cT))

    ref_lps, ref_hT, ref_cT = reference_forward_seq(xs, h0, c0, params)
    assert jnp.allclose(lps, ref_lps, atol=5e-2, rtol=5e-2)
    assert jnp.allclose(hT, ref_hT, atol=5e-2, rtol=5e-2)
    assert jnp.allclose(cT, ref_cT, atol=5e-2, rtol=5e-2)

    print("KERNEL_OK")
</pallas_src>

<mosaic_0001>
module attributes {stable_mosaic.version = 11 : i64} {
  func.func @_xproj_kernel(%arg0: i32, %arg1: memref<8x16xf32, #tpu.memory_space<vmem>>, %arg2: memref<16x512xbf16, #tpu.memory_space<vmem>>, %arg3: memref<1x512xf32, #tpu.memory_space<vmem>>, %arg4: memref<8x512xf32, #tpu.memory_space<vmem>>) attributes {dimension_semantics = [#tpu.dimension_semantics<parallel>], iteration_bounds = array<i64: 1>, scalar_prefetch = 0 : i64, scratch_operands = 0 : i64, tpu.core_type = #tpu.core_type<tc>, window_params = [{transform_indices = @transform_0, window_bounds = array<i64: 8, 16>}, {pipeline_mode = #tpu.pipeline_mode<synchronous>, transform_indices = @transform_1, window_bounds = array<i64: 16, 512>}, {pipeline_mode = #tpu.pipeline_mode<synchronous>, transform_indices = @transform_2, window_bounds = array<i64: 1, 512>}, {transform_indices = @transform_3, window_bounds = array<i64: 8, 512>}]} {
    %c0 = arith.constant 0 : index
    %c0_0 = arith.constant 0 : index
    %0 = vector.load %arg1[%c0, %c0_0] : memref<8x16xf32, #tpu.memory_space<vmem>>, vector<8x16xf32>
    %1 = arith.truncf %0 : vector<8x16xf32> to vector<8x16xbf16>
    %c0_1 = arith.constant 0 : index
    %c0_2 = arith.constant 0 : index
    %2 = vector.load %arg2[%c0_1, %c0_2] : memref<16x512xbf16, #tpu.memory_space<vmem>>, vector<16x512xbf16>
    %cst = arith.constant dense<0.000000e+00> : vector<8x512xf32>
    %3 = tpu.matmul %1, %2, %cst {dimension_numbers = #tpu.dot_dimension_numbers<[1], [0], [0], [1], [0, 0, 1, 1], [], []>} : vector<8x16xbf16>, vector<16x512xbf16>, vector<8x512xf32> -> vector<8x512xf32>
    %c0_3 = arith.constant 0 : index
    %c0_4 = arith.constant 0 : index
    %4 = vector.load %arg3[%c0_3, %c0_4] : memref<1x512xf32, #tpu.memory_space<vmem>>, vector<1x512xf32>
    %5 = vector.broadcast %4 : vector<1x512xf32> to vector<8x512xf32>
    %6 = arith.addf %3, %5 : vector<8x512xf32>
    %c0_5 = arith.constant 0 : index
    %c0_6 = arith.constant 0 : index
    %7 = vector.load %arg4[%c0_5, %c0_6] : memref<8x512xf32, #tpu.memory_space<vmem>>, vector<8x512xf32>
    tpu.vector_store %arg4[%c0_5, %c0_6], %6 {strides = array<i32>} : memref<8x512xf32, #tpu.memory_space<vmem>>, vector<8x512xf32>,
    return
  }
  func.func @transform_0(%arg0: i32) -> (i32, i32) {
    %c0_i32 = arith.constant 0 : i32
    %c0_i32_0 = arith.constant 0 : i32
    return %arg0, %c0_i32 : i32, i32
  }
  func.func @transform_1(%arg0: i32) -> (i32, i32) {
    %c0_i32 = arith.constant 0 : i32
    %c0_i32_0 = arith.constant 0 : i32
    %c0_i32_1 = arith.constant 0 : i32
    return %c0_i32, %c0_i32_0 : i32, i32
  }
  func.func @transform_2(%arg0: i32) -> (i32, i32) {
    %c0_i32 = arith.constant 0 : i32
    %c0_i32_0 = arith.constant 0 : i32
    %c0_i32_1 = arith.constant 0 : i32
    return %c0_i32, %c0_i32_0 : i32, i32
  }
  func.func @transform_3(%arg0: i32) -> (i32, i32) {
    %c0_i32 = arith.constant 0 : i32
    %c0_i32_0 = arith.constant 0 : i32
    return %arg0, %c0_i32 : i32, i32
  }
}

module attributes {stable_mosaic.version = 11 : i64} {
  func.func @_lstm_seq_kernel(%arg0: i32, %arg1: i32, %arg2: memref<8x512xf32, #tpu.memory_space<vmem>>, %arg3: memref<8x128xf32, #tpu.memory_space<vmem>>, %arg4: memref<8x128xf32, #tpu.memory_space<vmem>>, %arg5: memref<128x512xbf16, #tpu.memory_space<vmem>>, %arg6: memref<128x128xbf16, #tpu.memory_space<vmem>>, %arg7: memref<1x128xf32, #tpu.memory_space<vmem>>, %arg8: memref<1x8x128xf32, #tpu.memory_space<vmem>>, %arg9: memref<8x128xf32, #tpu.memory_space<vmem>>, %arg10: memref<8x128xf32, #tpu.memory_space<vmem>>, %arg11: memref<8x128xf32, #tpu.memory_space<vmem>>, %arg12: memref<8x128xf32, #tpu.memory_space<vmem>>) attributes {dimension_semantics = [#tpu.dimension_semantics<parallel>, #tpu.dimension_semantics<arbitrary>], iteration_bounds = array<i64: 1, 1>, scalar_prefetch = 0 : i64, scratch_operands = 2 : i64, tpu.core_type = #tpu.core_type<tc>, window_params = [{transform_indices = @transform_0, window_bounds = array<i64: 8, 512>}, {transform_indices = @transform_1, window_bounds = array<i64: 8, 128>}, {transform_indices = @transform_2, window_bounds = array<i64: 8, 128>}, {pipeline_mode = #tpu.pipeline_mode<synchronous>, transform_indices = @transform_3, window_bounds = array<i64: 128, 512>}, {pipeline_mode = #tpu.pipeline_mode<synchronous>, transform_indices = @transform_4, window_bounds = array<i64: 128, 128>}, {pipeline_mode = #tpu.pipeline_mode<synchronous>, transform_indices = @transform_5, window_bounds = array<i64: 1, 128>}, {transform_indices = @transform_6, window_bounds = array<i64: 1, 8, 128>}, {transform_indices = @transform_7, window_bounds = array<i64: 8, 128>}, {transform_indices = @transform_8, window_bounds = array<i64: 8, 128>}]} {
    %c0_i32 = arith.constant 0 : i32
    %0 = arith.cmpi eq, %arg1, %c0_i32 : i32
    %1 = arith.extui %0 : i1 to i32
    %c0_i32_0 = arith.constant 0 : i32
    %2 = arith.cmpi ne, %1, %c0_i32_0 : i32
    scf.if %2 {
      %c0_25 = arith.constant 0 : index
      %c0_26 = arith.constant 0 : index
      %50 = vector.load %arg3[%c0_25, %c0_26] : memref<8x128xf32, #tpu.memory_space<vmem>>, vector<8x128xf32>
      %c0_27 = arith.constant 0 : index
      %c0_28 = arith.constant 0 : index
      %51 = vector.load %arg11[%c0_27, %c0_28] : memref<8x128xf32, #tpu.memory_space<vmem>>, vector<8x128xf32>
      tpu.vector_store %arg11[%c0_27, %c0_28], %50 {strides = array<i32>} : memref<8x128xf32, #tpu.memory_space<vmem>>, vector<8x128xf32>,
      %c0_29 = arith.constant 0 : index
      %c0_30 = arith.constant 0 : index
      %52 = vector.load %arg4[%c0_29, %c0_30] : memref<8x128xf32, #tpu.memory_space<vmem>>, vector<8x128xf32>
      %c0_31 = arith.constant 0 : index
      %c0_32 = arith.constant 0 : index
      %53 = vector.load %arg12[%c0_31, %c0_32] : memref<8x128xf32, #tpu.memory_space<vmem>>, vector<8x128xf32>
      tpu.vector_store %arg12[%c0_31, %c0_32], %52 {strides = array<i32>} : memref<8x128xf32, #tpu.memory_space<vmem>>, vector<8x128xf32>,
    } else {
    }
    %c0 = arith.constant 0 : index
    %c0_1 = arith.constant 0 : index
    %3 = vector.load %arg11[%c0, %c0_1] : memref<8x128xf32, #tpu.memory_space<vmem>>, vector<8x128xf32>
    %c0_2 = arith.constant 0 : index
    %c0_3 = arith.constant 0 : index
    %4 = vector.load %arg12[%c0_2, %c0_3] : memref<8x128xf32, #tpu.memory_space<vmem>>, vector<8x128xf32>
    %c0_4 = arith.constant 0 : index
    %c0_5 = arith.constant 0 : index
    %5 = vector.load %arg2[%c0_4, %c0_5] : memref<8x512xf32, #tpu.memory_space<vmem>>, vector<8x512xf32>
    %6 = arith.truncf %3 : vector<8x128xf32> to vector<8x128xbf16>
    %c0_6 = arith.constant 0 : index
    %c0_7 = arith.constant 0 : index
    %7 = vector.load %arg5[%c0_6, %c0_7] : memref<128x512xbf16, #tpu.memory_space<vmem>>, vector<128x512xbf16>
    %cst = arith.constant dense<0.000000e+00> : vector<8x512xf32>
    %8 = tpu.matmul %6, %7, %cst {dimension_numbers = #tpu.dot_dimension_numbers<[1], [0], [0], [1], [0, 0, 1, 1], [], []>} : vector<8x128xbf16>, vector<128x512xbf16>, vector<8x512xf32> -> vector<8x512xf32>
    %9 = arith.addf %5, %8 : vector<8x512xf32>
    %10 = vector.extract_strided_slice %9 {offsets = [0, 0], sizes = [8, 384], strides = [1, 1]} : vector<8x512xf32> to vector<8x384xf32>
    %11 = arith.negf %10 : vector<8x384xf32>
    %12 = math.exp %11 : vector<8x384xf32>
    %cst_8 = arith.constant 1.000000e+00 : f32
    %13 = vector.broadcast %cst_8 : f32 to vector<8x384xf32>
    %14 = arith.addf %13, %12 : vector<8x384xf32>
    %15 = arith.divf %13, %14 : vector<8x384xf32>
    %16 = vector.extract_strided_slice %15 {offsets = [0, 0], sizes = [8, 128], strides = [1, 1]} : vector<8x384xf32> to vector<8x128xf32>
    %17 = vector.extract_strided_slice %15 {offsets = [0, 128], sizes = [8, 128], strides = [1, 1]} : vector<8x384xf32> to vector<8x128xf32>
    %18 = vector.extract_strided_slice %15 {offsets = [0, 256], sizes = [8, 128], strides = [1, 1]} : vector<8x384xf32> to vector<8x128xf32>
    %19 = vector.extract_strided_slice %9 {offsets = [0, 384], sizes = [8, 128], strides = [1, 1]} : vector<8x512xf32> to vector<8x128xf32>
    %20 = math.tanh %19 : vector<8x128xf32>
    %21 = arith.mulf %17, %4 : vector<8x128xf32>
    %22 = arith.mulf %16, %20 : vector<8x128xf32>
    %23 = arith.addf %21, %22 : vector<8x128xf32>
    %24 = math.tanh %23 : vector<8x128xf32>
    %25 = arith.mulf %18, %24 : vector<8x128xf32>
    %c0_9 = arith.constant 0 : index
    %c0_10 = arith.constant 0 : index
    %26 = vector.load %arg11[%c0_9, %c0_10] : memref<8x128xf32, #tpu.memory_space<vmem>>, vector<8x128xf32>
    tpu.vector_store %arg11[%c0_9, %c0_10], %25 {strides = array<i32>} : memref<8x128xf32, #tpu.memory_space<vmem>>, vector<8x128xf32>,
    %c0_11 = arith.constant 0 : index
    %c0_12 = arith.constant 0 : index
    %27 = vector.load %arg12[%c0_11, %c0_12] : memref<8x128xf32, #tpu.memory_space<vmem>>, vector<8x128xf32>
    tpu.vector_store %arg12[%c0_11, %c0_12], %23 {strides = array<i32>} : memref<8x128xf32, #tpu.memory_space<vmem>>, vector<8x128xf32>,
    %28 = arith.truncf %25 : vector<8x128xf32> to vector<8x128xbf16>
    %c0_13 = arith.constant 0 : index
    %c0_14 = arith.constant 0 : index
    %29 = vector.load %arg6[%c0_13, %c0_14] : memref<128x128xbf16, #tpu.memory_space<vmem>>, vector<128x128xbf16>
    %cst_15 = arith.constant dense<0.000000e+00> : vector<8x128xf32>
    %30 = tpu.matmul %28, %29, %cst_15 {dimension_numbers = #tpu.dot_dimension_numbers<[1], [0], [0], [1], [0, 0, 1, 1], [], []>} : vector<8x128xbf16>, vector<128x128xbf16>, vector<8x128xf32> -> vector<8x128xf32>
    %c0_16 = arith.constant 0 : index
    %c0_17 = arith.constant 0 : index
    %31 = vector.load %arg7[%c0_16, %c0_17] : memref<1x128xf32, #tpu.memory_space<vmem>>, vector<1x128xf32>
    %32 = vector.broadcast %31 : vector<1x128xf32> to vector<8x128xf32>
    %33 = arith.addf %30, %32 : vector<8x128xf32>
    %cst_18 = arith.constant dense<0xFF800000> : vector<8xf32>
    %34 = vector.multi_reduction <maximumf>, %33, %cst_18 [1] : vector<8x128xf32> to vector<8xf32>
    %35 = vector.shape_cast %34 : vector<8xf32> to vector<8x1xf32>
    %36 = vector.broadcast %35 : vector<8x1xf32> to vector<8x128xf32>
    %37 = arith.subf %33, %36 : vector<8x128xf32>
    %38 = math.exp %37 : vector<8x128xf32>
    %cst_19 = arith.constant dense<0.000000e+00> : vector<8xf32>
    %39 = vector.multi_reduction <add>, %38, %cst_19 [1] : vector<8x128xf32> to vector<8xf32>
    %40 = vector.shape_cast %39 : vector<8xf32> to vector<8x1xf32>
    %41 = math.log %40 : vector<8x1xf32>
    %42 = vector.broadcast %41 : vector<8x1xf32> to vector<8x128xf32>
    %43 = arith.subf %37, %42 : vector<8x128xf32>
    %c0_20 = arith.constant 0 : index
    %c0_21 = arith.constant 0 : index
    %c0_22 = arith.constant 0 : index
    %44 = vector.load %arg8[%c0_20, %c0_21, %c0_22] : memref<1x8x128xf32, #tpu.memory_space<vmem>>, vector<1x8x128xf32>
    %45 = vector.shape_cast %44 : vector<1x8x128xf32> to vector<8x128xf32>
    %46 = vector.shape_cast %43 : vector<8x128xf32> to vector<1x8x128xf32>
    tpu.vector_store %arg8[%c0_20, %c0_21, %c0_22], %46 {strides = array<i32>} : memref<1x8x128xf32, #tpu.memory_space<vmem>>, vector<1x8x128xf32>,
    %c0_i32_23 = arith.constant 0 : i32
    %47 = arith.cmpi eq, %arg1, %c0_i32_23 : i32
    %48 = arith.extui %47 : i1 to i32
    %c0_i32_24 = arith.constant 0 : i32
    %49 = arith.cmpi ne, %48, %c0_i32_24 : i32
    scf.if %49 {
      %c0_25 = arith.constant 0 : index
      %c0_26 = arith.constant 0 : index
      %50 = vector.load %arg9[%c0_25, %c0_26] : memref<8x128xf32, #tpu.memory_space<vmem>>, vector<8x128xf32>
      tpu.vector_store %arg9[%c0_25, %c0_26], %25 {strides = array<i32>} : memref<8x128xf32, #tpu.memory_space<vmem>>, vector<8x128xf32>,
      %c0_27 = arith.constant 0 : index
      %c0_28 = arith.constant 0 : index
      %51 = vector.load %arg10[%c0_27, %c0_28] : memref<8x128xf32, #tpu.memory_space<vmem>>, vector<8x128xf32>
      tpu.vector_store %arg10[%c0_27, %c0_28], %23 {strides = array<i32>} : memref<8x128xf32, #tpu.memory_space<vmem>>, vector<8x128xf32>,
    } else {
    }
    return
  }
  func.func @transform_0(%arg0: i32, %arg1: i32) -> (i32, i32) {
    %c1_i32 = arith.constant 1 : i32
    %0 = arith.muli %arg1, %c1_i32 : i32
    %1 = arith.addi %0, %arg0 : i32
    %c0_i32 = arith.constant 0 : i32
    %c0_i32_0 = arith.constant 0 : i32
    return %1, %c0_i32 : i32, i32
  }
  func.func @transform_1(%arg0: i32, %arg1: i32) -> (i32, i32) {
    %c0_i32 = arith.constant 0 : i32
    %c0_i32_0 = arith.constant 0 : i32
    return %arg0, %c0_i32 : i32, i32
  }
  func.func @transform_2(%arg0: i32, %arg1: i32) -> (i32, i32) {
    %c0_i32 = arith.constant 0 : i32
    %c0_i32_0 = arith.constant 0 : i32
    return %arg0, %c0_i32 : i32, i32
  }
  func.func @transform_3(%arg0: i32, %arg1: i32) -> (i32, i32) {
    %c0_i32 = arith.constant 0 : i32
    %c0_i32_0 = arith.constant 0 : i32
    %c0_i32_1 = arith.constant 0 : i32
    return %c0_i32, %c0_i32_0 : i32, i32
  }
  func.func @transform_4(%arg0: i32, %arg1: i32) -> (i32, i32) {
    %c0_i32 = arith.constant 0 : i32
    %c0_i32_0 = arith.constant 0 : i32
    %c0_i32_1 = arith.constant 0 : i32
    return %c0_i32, %c0_i32_0 : i32, i32
  }
  func.func @transform_5(%arg0: i32, %arg1: i32) -> (i32, i32) {
    %c0_i32 = arith.constant 0 : i32
    %c0_i32_0 = arith.constant 0 : i32
    %c0_i32_1 = arith.constant 0 : i32
    return %c0_i32, %c0_i32_0 : i32, i32
  }
  func.func @transform_6(%arg0: i32, %arg1: i32) -> (i32, i32, i32) {
    %c0_i32 = arith.constant 0 : i32
    %c0_i32_0 = arith.constant 0 : i32
    return %arg1, %arg0, %c0_i32 : i32, i32, i32
  }
  func.func @transform_7(%arg0: i32, %arg1: i32) -> (i32, i32) {
    %c0_i32 = arith.constant 0 : i32
    %c0_i32_0 = arith.constant 0 : i32
    return %arg0, %c0_i32 : i32, i32
  }
  func.func @transform_8(%arg0: i32, %arg1: i32) -> (i32, i32) {
    %c0_i32 = arith.constant 0 : i32
    %c0_i32_0 = arith.constant 0 : i32
    return %arg0, %c0_i32 : i32, i32
  }
}

</mosaic_0001>

<bundles_post_ra>
// kernel: lstm_model_forward_seq.2
= control target key start
LH: loop header
LB: loop body
LE: loop exit
PB: predicated region body
PF: predicated region fallthrough
CT: control target
= control target key end

     0   :  { %v170_v1 = vmov 0   ;;  %vm63_vm0 = vcmask 130048   ;;  %v23_v7 = vlaneseq  ;;  %s221_s1 = inlined_call_operand.vmem [shape: bf16[16,512], index: 1, kind: input, shape index: {}]   ;;  %s222_s0 = inlined_call_operand.vmem [shape: f32[8,16], index: 0, kind: input, shape index: {}]   ;;  %s223_s2 = inlined_call_operand.vmem [shape: f32[1,512], index: 2, kind: input, shape index: {}]   ;;  %s224_s3 = inlined_call_operand.vmem [shape: f32[8,512], index: 3, kind: output, shape index: {}]  }
   0x1   :  { %v164_v0 = vld [vmem:[%s221_s1 + $0x4] ss:$16 sps:$4 sm:$0xff]   ;;  %99 = vmatprep.mubr.bf16.mxu0 %v170_v1  ;;  %140 = vmatprep.mubr.bf16.mxu1 %v170_v1  ;;  %v166_v2 = vld [vmem:[%s221_s1 + $0xc] ss:$16 sps:$4 sm:$0xff]   ;;  %v168_v3 = vld [vmem:[%s221_s1] ss:$16 sps:$4 sm:$0xff]  }
   0x2   :  { %81 = vmatprep.subr.bf16.mxu0 %v164_v0  ;;  %v169_v4 = vld [vmem:[%s221_s1 + $0x8] ss:$16 sps:$4 sm:$0xff]   ;;  %v15_v5 = vld [vmem:[%s222_s0] sm:$0xff]  ;;  %122 = vmatprep.subr.bf16.mxu1 %v166_v2  ;;  %v24_v8 = vshrl.u32 %v23_v7, 7 }
   0x3   :  { %v16_v6 = vpack.c.bf16 %v15_v5, %v15_v5  ;;  %82 = vmatpush1.bf16.msra.mxu0 %v168_v3  ;;  %123 = vmatpush1.bf16.msra.mxu1 %v169_v4  ;;  %v21_v11 = vld [vmem:[%s223_s2] sm:$0xf] }
   0x4   :  { %v25_v9 = vsub.s32 0, %v24_v8  ;;  %v33_v10 = vsub.s32 2, %v24_v8  ;;  %v29_v12 = vsub.s32 1, %v24_v8  ;;  %v37_v13 = vsub.s32 3, %v24_v8 }
   0x6   :  { %161 = vmatmul.mubr.msk.bf16.vlgmr.msra.gmra.mxu0 %vm63_vm0, %v16_v6  ;;  %162 = vmatmul.mubr.msk.bf16.vlgmr.msra.gmra.mxu1 %vm63_vm0, %v16_v6  ;;  %v26_v14 = vrot.slane %v21_v11, %v25_v9  ;;  %v34_v15 = vrot.slane %v21_v11, %v33_v10  ;;  %v30_v16 = vrot.slane %v21_v11, %v29_v12 }
   0x7   :  { %v38_v17 = vrot.slane %v21_v11, %v37_v13 }
  0xc6   :  { %v101_v18 = vpop.f32.mrf.mxu0  ;;  %v142_v19 = vpop.f32.mrf.mxu1 }
  0xc7   :  { %v102_v20 = vadd.f32 %v101_v18, %v26_v14  ;;  %v143_v21 = vadd.f32 %v142_v19, %v34_v15 }
  0xc8   :  { %v103_v22 = vpop.f32.mrf.mxu0  ;;  %v144_v23 = vpop.f32.mrf.mxu1 }
  0xc9   :  { %149 = vst [vmem:[%s224_s3] sm:$0xff] %v102_v20  ;;  %151 = vst [vmem:[%s224_s3 + $0x10] sm:$0xff] %v143_v21  ;;  %v104_v24 = vadd.f32 %v103_v22, %v30_v16  ;;  %v145_v25 = vadd.f32 %v144_v23, %v38_v17 }
  0xca   :  { %v105_v26 = vpop.f32.mrf.mxu0  ;;  %v146_v27 = vpop.f32.mrf.mxu1 }
  0xcb   :  { %150 = vst [vmem:[%s224_s3 + $0x8] sm:$0xff] %v104_v24  ;;  %152 = vst [vmem:[%s224_s3 + $0x18] sm:$0xff] %v145_v25 }
  0xcc   :  { %v106_v28 = vpop.f32.mrf.mxu0  ;;  %v147_v29 = vpop.f32.mrf.mxu1 }

// kernel: lstm_model_forward_seq.3
= control target key start
LH: loop header
LB: loop body
LE: loop exit
PB: predicated region body
PF: predicated region fallthrough
CT: control target
= control target key end

     0   :  { %14 = vsyncpa [#allocation5], 0  ;;  %s704_s27 = smov [#allocation4]   ;;  %s812_s0 = inlined_call_operand.vmem [shape: f32[8,512], index: 0, kind: input, shape index: {}]   ;;  %s813_s1 = inlined_call_operand.vmem [shape: f32[8,128], index: 1, kind: input, shape index: {}, may-alias: {1,7}]   ;;  %s814_s2 = inlined_call_operand.vmem [shape: f32[8,128], index: 2, kind: input, shape index: {}, may-alias: {2,8}]   ;;  %s815_s3 = inlined_call_operand.hbm [shape: bf16[128,512], index: 3, kind: input, shape index: {}]   ;;  %s816_s4 = inlined_call_operand.vmem [shape: bf16[128,128], index: 4, kind: input, shape index: {}]   ;;  %s817_s5 = inlined_call_operand.vmem [shape: f32[1,128], index: 5, kind: input, shape index: {}]   ;;  %s818_s6 = inlined_call_operand.vmem [shape: f32[1,8,128], index: 6, kind: output, shape index: {0}]   ;;  %s819_s7 = inlined_call_operand.vmem [shape: f32[8,128], index: 7, kind: output, shape index: {1}, may-alias: {1,7}]   ;;  %s820_s8 = inlined_call_operand.vmem [shape: f32[8,128], index: 8, kind: output, shape index: {2}, may-alias: {2,8}]  }
   0x1   :  { %s33_s28 = sshll.u32 %s704_s27, 4  ;;  %s34_s28 = int_to_ptr.vmem [resolvable:$true] %s33_s28 }
   0x2   :  { %s690_s29 = scalar_lea.vmem %s34_s28, 4096  ;;  %p695_p1 = scmp.lt.s32.totalorder %s34_s28, %s34_s28 }
   0x3   :  { %p691_p0 = scmp.ne.s32.totalorder %s34_s28, %s690_s29  ;;  %p696_p2 = scmp.lt.s32.totalorder %s690_s29, %s690_s29 }
   0x5   :  { %p697_p3 = por %p696_p2, %p695_p1 }
   0x7   :  { %p698_p4 = pnand %p697_p3, %p691_p0 }
   0x9   :  { %701 = shalt.err (!%p698_p4)
}
   0xa   :  { %s705_s30 = smov 256   ;;  %s706_s9 = smov 16  }
   0xb   :  { %39 = dma.hbm_to_vmem [thread:$0]  %s815_s3, 4096, %s34_s28, [#allocation5], %s705_s30, %s705_s30, %s706_s9  }
   0xc   :  { %702 = dma.done.wait [#allocation5], 4096  }
   0xd   :  { %703 = vsyncadd [#allocation5], 4294963200  ;;  %v707_v0 = vmov 0   ;;  %v606_v1 = vld [vmem:[#allocation4 + $0xe4] ss:$16 sps:$4 sm:$0xff]   ;;  %v654_v35 = vld [vmem:[%s816_s4 + $0x38] sm:$0xff]  }
   0xe   :  { %300 = vmatprep.mubr.bf16.mxu0 %v707_v0  ;;  %341 = vmatprep.mubr.bf16.mxu1 %v707_v0  ;;  %v608_v2 = vld [vmem:[#allocation4 + $0xe0] ss:$16 sps:$4 sm:$0xff]   ;;  %v609_v3 = vld [vmem:[#allocation4 + $0xc4] ss:$16 sps:$4 sm:$0xff]   ;;  %v617_v6 = vld [vmem:[#allocation4 + $0xec] ss:$16 sps:$4 sm:$0xff]  }
   0xf   :  { %268 = vmatprep.subr.bf16.mxu0 %v606_v1  ;;  %v611_v4 = vld [vmem:[#allocation4 + $0xc0] ss:$16 sps:$4 sm:$0xff]   ;;  %v612_v5 = vld [vmem:[#allocation4 + $0xa4] ss:$16 sps:$4 sm:$0xff]   ;;  %v620_v7 = vld [vmem:[#allocation4 + $0xe8] ss:$16 sps:$4 sm:$0xff]   ;;  %309 = vmatprep.subr.bf16.mxu1 %v617_v6 }
  0x10   :  { %269 = vmatpush1.bf16.msra.mxu0 %v608_v2  ;;  %v614_v8 = vld [vmem:[#allocation4 + $0xa0] ss:$16 sps:$4 sm:$0xff]   ;;  %v615_v9 = vld [vmem:[#allocation4 + $0x84] ss:$16 sps:$4 sm:$0xff]   ;;  %310 = vmatpush1.bf16.msra.mxu1 %v620_v7  ;;  %v623_v10 = vld [vmem:[#allocation4 + $0xcc] ss:$16 sps:$4 sm:$0xff]  }
  0x11   :  { %270 = vmatprep.subr.bf16.mxu0 %v609_v3  ;;  %v626_v11 = vld [vmem:[#allocation4 + $0xc8] ss:$16 sps:$4 sm:$0xff]   ;;  %311 = vmatprep.subr.bf16.mxu1 %v623_v10  ;;  %v619_v12 = vld [vmem:[#allocation4 + $0x80] ss:$16 sps:$4 sm:$0xff]   ;;  %v621_v13 = vld [vmem:[#allocation4 + $0x64] ss:$16 sps:$4 sm:$0xff]  }
  0x12   :  { %v629_v14 = vld [vmem:[#allocation4 + $0xac] ss:$16 sps:$4 sm:$0xff]   ;;  %v632_v15 = vld [vmem:[#allocation4 + $0xa8] ss:$16 sps:$4 sm:$0xff]   ;;  %v625_v17 = vld [vmem:[#allocation4 + $0x60] ss:$16 sps:$4 sm:$0xff]  }
  0x13   :  { %v635_v16 = vld [vmem:[#allocation4 + $0x8c] ss:$16 sps:$4 sm:$0xff]   ;;  %v627_v18 = vld [vmem:[#allocation4 + $0x44] ss:$16 sps:$4 sm:$0xff]   ;;  %v638_v19 = vld [vmem:[#allocation4 + $0x88] ss:$16 sps:$4 sm:$0xff]  }
  0x14   :  { %271 = vmatpush1.bf16.msra.mxu0 %v611_v4  ;;  %312 = vmatpush1.bf16.msra.mxu1 %v626_v11  ;;  %v641_v20 = vld [vmem:[#allocation4 + $0x6c] ss:$16 sps:$4 sm:$0xff]   ;;  %v631_v21 = vld [vmem:[#allocation4 + $0x40] ss:$16 sps:$4 sm:$0xff]   ;;  %v633_v22 = vld [vmem:[#allocation4 + $0x24] ss:$16 sps:$4 sm:$0xff]  }
  0x15   :  { %272 = vmatprep.subr.bf16.mxu0 %v612_v5  ;;  %313 = vmatprep.subr.bf16.mxu1 %v629_v14  ;;  %v644_v23 = vld [vmem:[#allocation4 + $0x68] ss:$16 sps:$4 sm:$0xff]   ;;  %v637_v24 = vld [vmem:[#allocation4 + $0x20] ss:$16 sps:$4 sm:$0xff]   ;;  %v645_v25 = vld [vmem:[#allocation4 + $0x4c] ss:$16 sps:$4 sm:$0xff]  }
  0x16   :  { %v639_v26 = vld [vmem:[#allocation4 + $0x4] ss:$16 sps:$4 sm:$0xff]   ;;  %v647_v27 = vld [vmem:[#allocation4 + $0x48] ss:$16 sps:$4 sm:$0xff]   ;;  %v648_v28 = vld [vmem:[#allocation4 + $0x2c] ss:$16 sps:$4 sm:$0xff]  }
  0x17   :  { %v643_v29 = vld [vmem:[#allocation4] ss:$16 sps:$4 sm:$0xff]   ;;  %v650_v31 = vld [vmem:[#allocation4 + $0x28] ss:$16 sps:$4 sm:$0xff]   ;;  %v651_v32 = vld [vmem:[#allocation4 + $0xc] ss:$16 sps:$4 sm:$0xff]  }
  0x18   :  { %273 = vmatpush1.bf16.msra.mxu0 %v614_v8  ;;  %314 = vmatpush1.bf16.msra.mxu1 %v632_v15  ;;  %v65_v30 = vld [vmem:[%s813_s1] sm:$0xff]  ;;  %v653_v34 = vld [vmem:[#allocation4 + $0x8] ss:$16 sps:$4 sm:$0xff]   ;;  %v708_v36 = vmov 0.0   ;;  %v655_v37 = vld [vmem:[%s816_s4 + $0x30] sm:$0xff]   ;;  %vm709_vm0 = vmmov 0  }
  0x19   :  { %274 = vmatprep.subr.bf16.mxu0 %v615_v9  ;;  %315 = vmatprep.subr.bf16.mxu1 %v635_v16  ;;  %v75_v33 = vpack.c.bf16 %v65_v30, %v65_v30  ;;  %v656_v38 = vld [vmem:[%s816_s4 + $0x28] sm:$0xff]   ;;  %v657_v39 = vld [vmem:[%s816_s4 + $0x20] sm:$0xff]   ;;  %v658_v40 = vld [vmem:[%s816_s4 + $0x18] sm:$0xff]  }
  0x1a   :  { %v659_v41 = vld [vmem:[%s816_s4 + $0x10] sm:$0xff]   ;;  %v660_v42 = vld [vmem:[%s816_s4 + $0x8] sm:$0xff]   ;;  %v661_v43 = vld [vmem:[%s816_s4] sm:$0xff]  }
  0x1b   :  { %v71_v44 = vld [vmem:[%s812_s0] sm:$0xff]  ;;  %v72_v46 = vld [vmem:[%s812_s0 + $0x8] sm:$0xff]  ;;  %v73_v56 = vld [vmem:[%s812_s0 + $0x10] sm:$0xff] }
  0x1c   :  { %275 = vmatpush1.bf16.msra.mxu0 %v619_v12  ;;  %316 = vmatpush1.bf16.msra.mxu1 %v638_v19  ;;  %v74_v60 = vld [vmem:[%s812_s0 + $0x18] sm:$0xff]  ;;  %v67_v6 = vld [vmem:[%s814_s2] sm:$0xff] }
  0x1d   :  { %276 = vmatprep.subr.bf16.mxu0 %v621_v13  ;;  %317 = vmatprep.subr.bf16.mxu1 %v641_v20  ;;  %v562_v16 = vld [vmem:[%s817_s5] ss:$0 sm:$0xff] }
  0x20   :  { %277 = vmatpush1.bf16.msra.mxu0 %v625_v17  ;;  %318 = vmatpush1.bf16.msra.mxu1 %v644_v23 }
  0x21   :  { %278 = vmatprep.subr.bf16.mxu0 %v627_v18  ;;  %319 = vmatprep.subr.bf16.mxu1 %v645_v25 }
  0x24   :  { %279 = vmatpush1.bf16.msra.mxu0 %v631_v21  ;;  %320 = vmatpush1.bf16.msra.mxu1 %v647_v27 }
  0x25   :  { %280 = vmatprep.subr.bf16.mxu0 %v633_v22  ;;  %321 = vmatprep.subr.bf16.mxu1 %v648_v28 }
  0x28   :  { %281 = vmatpush1.bf16.msra.mxu0 %v637_v24  ;;  %322 = vmatpush1.bf16.msra.mxu1 %v650_v31 }
  0x29   :  { %282 = vmatprep.subr.bf16.mxu0 %v639_v26  ;;  %323 = vmatprep.subr.bf16.mxu1 %v651_v32 }
  0x2c   :  { %283 = vmatpush1.bf16.msra.mxu0 %v643_v29  ;;  %324 = vmatpush1.bf16.msra.mxu1 %v653_v34 }
  0x2d   :  { %580 = vmatprep.subr.bf16.mxu0 %v708_v36 }
  0x2f   :  { %301 = vmatmul.mubr.bf16.vlgmr.msra.gmra.mxu0 %v75_v33  ;;  %342 = vmatmul.mubr.bf16.vlgmr.msra.gmra.mxu1 %v75_v33 }
  0x30   :  { %581 = vmatpush3.bf16.msra.mxu0 %v654_v35  ;;  %596 = vmatprep.mubr.msk.bf16.mxu0 %vm709_vm0, %v708_v36 }
  0x31   :  { %582 = vmatprep.subr.bf16.mxu0 %v708_v36 }
  0x34   :  { %583 = vmatpush3.bf16.msra.mxu0 %v655_v37 }
  0x35   :  { %584 = vmatprep.subr.bf16.mxu0 %v708_v36 }
  0x38   :  { %585 = vmatpush3.bf16.msra.mxu0 %v656_v38 }
  0x39   :  { %586 = vmatprep.subr.bf16.mxu0 %v708_v36 }
  0x3c   :  { %587 = vmatpush3.bf16.msra.mxu0 %v657_v39 }
  0x3d   :  { %588 = vmatprep.subr.bf16.mxu0 %v708_v36 }
  0x40   :  { %589 = vmatpush3.bf16.msra.mxu0 %v658_v40 }
  0x41   :  { %590 = vmatprep.subr.bf16.mxu0 %v708_v36 }
  0x44   :  { %591 = vmatpush3.bf16.msra.mxu0 %v659_v41 }
  0x45   :  { %592 = vmatprep.subr.bf16.mxu0 %v708_v36 }
  0x48   :  { %593 = vmatpush3.bf16.msra.mxu0 %v660_v42 }
  0x49   :  { %594 = vmatprep.subr.bf16.mxu0 %v708_v36 }
  0x4c   :  { %595 = vmatpush3.bf16.msra.mxu0 %v661_v43 }
  0xef   :  { %v302_v45 = vpop.f32.mrf.mxu0  ;;  %v343_v53 = vpop.f32.mrf.mxu1 }
  0xf0   :  { %v350_v47 = vadd.f32 %v302_v45, %v71_v44  ;;  %v352_v58 = vadd.f32 %v343_v53, %v73_v56 }
  0xf1   :  { %v304_v48 = vpop.f32.mrf.mxu0  ;;  %v345_v55 = vpop.f32.mrf.mxu1 }
  0xf2   :  { %v559_v49 = vmul.f32 -1.442695, %v350_v47  ;;  %v351_v50 = vadd.f32 %v304_v48, %v72_v46  ;;  %v561_v61 = vmul.f32 -1.442695, %v352_v58  ;;  %v353_v62 = vadd.f32 %v345_v55, %v74_v60 }
  0xf3   :  { %v306_v51 = vpop.f32.mrf.mxu0  ;;  %v347_v57 = vpop.f32.mrf.mxu1 }
  0xf4   :  { %662 = vpow2.f32 %v559_v49  ;;  %v560_v52 = vmul.f32 -1.442695, %v351_v50 }
  0xf5   :  { %v307_v54 = vpop.f32.mrf.mxu0  ;;  %v348_v59 = vpop.f32.mrf.mxu1 }
  0xf6   :  { %664 = vpow2.f32 %v560_v52 }
  0xf7   :  { %666 = vpow2.f32 %v561_v61 }
  0xf8   :  { %668 = vtanh.f32 %v353_v62 }
 0x101   :  { %v663_v63 = vpop.eup %662 }
 0x102   :  { %v363_v0 = vadd.f32 1.0, %v663_v63 }
 0x103   :  { %v665_v1 = vpop.eup %664 }
 0x104   :  { %670 = vrcp.f32 %v363_v0  ;;  %v364_v2 = vadd.f32 1.0, %v665_v1  ;;  %v667_v3 = vpop.eup %666 }
 0x105   :  { %v669_v4 = vpop.eup %668  ;;  %v365_v8 = vadd.f32 1.0, %v667_v3 }
 0x106   :  { %672 = vrcp.f32 %v364_v2 }
 0x107   :  { %674 = vrcp.f32 %v365_v8 }
 0x111   :  { %v671_v5 = vpop.eup %670 }
 0x112   :  { %v374_v10 = vmul.f32 %v671_v5, %v669_v4 }
 0x113   :  { %v673_v7 = vpop.eup %672 }
 0x114   :  { %v373_v9 = vmul.f32 %v673_v7, %v67_v6  ;;  %v675_v12 = vpop.eup %674 }
 0x116   :  { %v375_v11 = vadd.f32 %v374_v10, %v373_v9 }
 0x118   :  { %676 = vtanh.f32 %v375_v11  ;;  %507 = vst [vmem:[%s820_s8] sm:$0xff] %v375_v11 }
 0x125   :  { %v677_v13 = vpop.eup %676 }
 0x126   :  { %v377_v14 = vmul.f32 %v677_v13, %v675_v12 }
 0x128   :  { %v380_v15 = vpack.c.bf16 %v377_v14, %v377_v14  ;;  %506 = vst [vmem:[%s819_s7] sm:$0xff] %v377_v14 }
 0x12a   :  { %597 = vmatmul.mubr.bf16.vlgmr.msra.gmra.mxu0 %v380_v15 }
 0x1ea   :  { %v486_v17 = vpop.f32.mrf.mxu0 }
 0x1eb   :  { %v487_v18 = vadd.f32 %v562_v16, %v486_v17 }
 0x1ec   :  { %v598_v19 = vpop.f32.mrf.mxu0 }
 0x1ed   :  { %492 = vmax.xlane.f32.xlu0 %v487_v18 }
 0x1ee   :  { %v489_v20 = vpop.f32.mrf.mxu0 }
 0x1f0   :  { %v599_v21 = vpop.f32.mrf.mxu0 }
 0x276   :  { %v493_v22 = vpop.xlane.xlu0 %492 }
 0x277   :  { %v494_v23 = vsub.f32 %v487_v18, %v493_v22 }
 0x279   :  { %v495_v24 = vmul.f32 1.442695, %v494_v23 }
 0x27b   :  { %678 = vpow2.f32 %v495_v24 }
 0x288   :  { %v679_v25 = vpop.eup %678 }
 0x289   :  { %497 = vadd.xlane.f32.xlu0 %v679_v25 }
 0x312   :  { %v498_v26 = vpop.xlane.xlu0 %497 }
 0x313   :  { %680 = vlog2.f32 %v498_v26 }
 0x320   :  { %v681_v27 = vpop.eup %680 }
 0x321   :  { %v500_v28 = vmul.f32 0.6931472, %v681_v27 }
 0x323   :  { %v501_v29 = vsub.f32 %v494_v23, %v500_v28 }
 0x325   :  { %502 = vst [vmem:[%s818_s6] sm:$0xff] %v501_v29 }
 0x326   :  { %520 = vsyncpa [#allocation5], 1 }

</bundles_post_ra>
